<compile_context>
chip_gen: v6e
topology: v6e:2x2x1
jax: 0.10.0
libtpu: 0.0.40
codegen_flags: <defaults>
</compile_context>

<pallas_src>
import functools
import math

import jax
import jax.numpy as jnp
from jax.experimental import pallas as pl
from jax.experimental.pallas import tpu as pltpu


def _round_up(a, m):
    return (a + m - 1) // m * m


def _width_pad_kernel(x_ref, o_ref, *, pad, w, w_out, k, value):
    # x_ref: (TR, k*w)  o_ref: (TR, k*w_out); folded row = k original rows
    # laid side by side along the lane dimension.
    rows = o_ref.shape[0]
    dt = o_ref.dtype

    if pad > 0:
        # Constant border strips only -- the interior is never written twice.
        # Right pad of folded group j is lane-adjacent to left pad of group
        # j+1, so the interior (k-1) strips are merged into width-2*pad stores.
        edge = jnp.full((rows, pad), value, dtype=dt)
        o_ref[:, 0:pad] = edge                                    # leading left pad
        if k > 1:
            mid = jnp.full((rows, 2 * pad), value, dtype=dt)      # hoisted (no per-iter broadcast)
            for j in range(k - 1):
                s = j * w_out + pad + w
                o_ref[:, s:s + 2 * pad] = mid
        s = (k - 1) * w_out + pad + w
        o_ref[:, s:s + pad] = edge                                # trailing right pad

    # Interior copies: one static-slice store per folded group.
    for j in range(k):
        d0 = j * w_out + pad
        o_ref[:, d0:d0 + w] = x_ref[:, j * w:(j + 1) * w].astype(dt)


class WidthPadder:
    """JAX/Pallas equivalent of the PyTorch WidthPadder module."""

    def __init__(self, pad_dim=2, pad_to_width=176, value=0):
        self.pad_dim = pad_dim
        self.pad_to_width = pad_to_width
        self.value = value

    def __call__(self, x):
        # Mirrors the PyTorch forward: pad amount computed from input.shape[2],
        # padding applied to the last dim.
        need_to_pad = self.pad_to_width - x.shape[2]
        if need_to_pad & 1:
            raise Exception("Padding needs to be even on both sides")
        if need_to_pad < 0:
            # TODO(synk): torch F.pad with negative pads would crop; unsupported here.
            raise ValueError("pad_to_width is smaller than input.shape[2]; "
                             "negative padding is not supported")
        pad = need_to_pad // 2
        if pad == 0:
            # Nothing to pad: skip the kernel launch entirely.
            return x

        n, c, h, w = x.shape
        w_out = w + 2 * pad
        rows = n * c * h
        itemsize = jnp.dtype(x.dtype).itemsize

        # ---- Lane-dense row folding ----------------------------------------
        # Fold k consecutive rows into the lane dim so the output block's last
        # dim is a multiple of 128 (unmasked stores, dense VMEM, fat writeback
        # DMAs).  k is a power of two; shrink until it divides `rows`.
        k = 128 // math.gcd(w_out, 128)
        while k > 1 and rows % k:
            k //= 2
        # TODO(synk): for rows not divisible by any useful k, an HBM->HBM
        # strided interior DMA (memory_space=pl.ANY) would beat the k==1 path.
        rows_f = rows // k
        wf_in, wf_out = k * w, k * w_out
        x2d = x.reshape(rows_f, wf_in)

        # ---- Generation-aware tile budget -----------------------------------
        try:
            vmem_cap = int(pltpu.get_tpu_info().vmem_capacity_bytes)
        except Exception:
            vmem_cap = 64 << 20          # conservative: v7x per-TC VMEM
        tile_budget = min(16 << 20, vmem_cap // 6)   # per-step (in+out); 2x when double-buffered

        # VMEM footprint uses lane-padded widths (128-lane tiling).
        row_bytes_vmem = (_round_up(wf_in, 128) + _round_up(wf_out, 128)) * itemsize
        tr = max(32, (tile_budget // max(row_bytes_vmem, 1)) // 32 * 32)
        tr = min(tr, _round_up(rows_f, 32))
        # Megacore (v7x): make sure there are >= 2 grid steps when there's
        # enough work, so ("parallel",) actually uses both TensorCores.
        if rows_f >= 64 and (rows_f + tr - 1) // tr == 1:
            tr = max(32, _round_up((rows_f + 1) // 2, 32))
        grid = (pl.cdiv(rows_f, tr),)     # tail block: OOB output rows are masked

        # Cover the double-buffered (in + out) footprint plus headroom.
        # TODO(synk): no width tiling -- a single folded row wider than the
        # budget would need an extra W grid axis.
        vmem_limit = max(16 << 20, 2 * tr * row_bytes_vmem + (4 << 20))

        kernel = functools.partial(_width_pad_kernel, pad=pad, w=w, w_out=w_out,
                                   k=k, value=self.value)

        out2d = pl.pallas_call(
            kernel,
            out_shape=jax.ShapeDtypeStruct((rows_f, wf_out), x.dtype),
            grid_spec=pltpu.PrefetchScalarGridSpec(
                num_scalar_prefetch=0,
                grid=grid,
                in_specs=[pl.BlockSpec((tr, wf_in), lambda i: (i, 0))],
                out_specs=pl.BlockSpec((tr, wf_out), lambda i: (i, 0)),
            ),
            compiler_params=pltpu.CompilerParams(
                dimension_semantics=("parallel",),   # shards row loop across TCs (v7x)
                vmem_limit_bytes=int(vmem_limit),
            ),
        )(x2d)

        return out2d.reshape(n, c, h, w_out)


def _ref_pad(x, pad_to_width, value):
    pad = (pad_to_width - x.shape[2]) // 2
    return jnp.pad(x, ((0, 0), (0, 0), (0, 0), (pad, pad)),
                   mode="constant", constant_values=value)


if __name__ == "__main__":
    key = jax.random.PRNGKey(0)

    # Case 1: small NCHW input, H == W; w_out=24 -> fold k=16 (384 lanes).
    x = jax.random.normal(key, (2, 4, 16, 16), dtype=jnp.float32)
    padder = WidthPadder(pad_dim=2, pad_to_width=24, value=0)
    out = jax.block_until_ready(padder(x))
    ref = _ref_pad(x, 24, 0)
    assert out.shape == (2, 4, 16, 24), out.shape
    assert out.dtype == x.dtype
    assert jnp.array_equal(out, ref)

    # Case 2: rows (30) not divisible by the ideal fold (64) -> k shrinks to 2;
    # non-zero pad value; exercises merged middle strips + masked tail rows.
    x2 = jax.random.normal(jax.random.PRNGKey(0), (1, 3, 10, 16), dtype=jnp.float32)
    padder2 = WidthPadder(pad_dim=2, pad_to_width=24, value=1.5)
    out2 = jax.block_until_ready(padder2(x2))
    ref2 = _ref_pad(x2, 24, 1.5)
    assert out2.shape == (1, 3, 10, 30), out2.shape
    assert jnp.array_equal(out2, ref2)

    # Case 3: need_to_pad == 0 short-circuit.
    padder3 = WidthPadder(pad_dim=2, pad_to_width=16, value=0)
    out3 = jax.block_until_ready(padder3(x))
    assert jnp.array_equal(out3, x)

    # Case 4: module defaults (pad_to_width=176), fold k=8 (1408 lanes) and a
    # 2-step row grid (megacore path).
    x4 = jax.random.normal(jax.random.PRNGKey(0), (2, 4, 168, 168), dtype=jnp.float32)
    padder4 = WidthPadder()          # pad_to_width=176, value=0
    out4 = jax.block_until_ready(padder4(x4))
    ref4 = _ref_pad(x4, 176, 0)
    assert out4.shape == (2, 4, 168, 176), out4.shape
    assert jnp.array_equal(out4, ref4)

    print("KERNEL_OK")
</pallas_src>

<mosaic_0001>
module attributes {stable_mosaic.version = 11 : i64} {
  func.func @_width_pad_kernel(%arg0: i32, %arg1: memref<32x256xf32, #tpu.memory_space<vmem>>, %arg2: memref<32x384xf32, #tpu.memory_space<vmem>>) attributes {dimension_semantics = [#tpu.dimension_semantics<parallel>], iteration_bounds = array<i64: 1>, scalar_prefetch = 0 : i64, scratch_operands = 0 : i64, tpu.core_type = #tpu.core_type<tc>, window_params = [{transform_indices = @transform_0, window_bounds = array<i64: 32, 256>}, {transform_indices = @transform_1, window_bounds = array<i64: 32, 384>}]} {
    %cst = arith.constant 0.000000e+00 : f32
    %0 = vector.broadcast %cst : f32 to vector<32x4xf32>
    %c0 = arith.constant 0 : index
    %c0_0 = arith.constant 0 : index
    %1 = vector.load %arg2[%c0, %c0_0] : memref<32x384xf32, #tpu.memory_space<vmem>>, vector<32x4xf32>
    tpu.vector_store %arg2[%c0, %c0_0], %0 {strides = array<i32>} : memref<32x384xf32, #tpu.memory_space<vmem>>, vector<32x4xf32>,
    %cst_1 = arith.constant 0.000000e+00 : f32
    %2 = vector.broadcast %cst_1 : f32 to vector<32x8xf32>
    %c0_2 = arith.constant 0 : index
    %c20 = arith.constant 20 : index
    %3 = vector.load %arg2[%c0_2, %c20] : memref<32x384xf32, #tpu.memory_space<vmem>>, vector<32x8xf32>
    tpu.vector_store %arg2[%c0_2, %c20], %2 {strides = array<i32>} : memref<32x384xf32, #tpu.memory_space<vmem>>, vector<32x8xf32>,
    %c0_3 = arith.constant 0 : index
    %c44 = arith.constant 44 : index
    %4 = vector.load %arg2[%c0_3, %c44] : memref<32x384xf32, #tpu.memory_space<vmem>>, vector<32x8xf32>
    tpu.vector_store %arg2[%c0_3, %c44], %2 {strides = array<i32>} : memref<32x384xf32, #tpu.memory_space<vmem>>, vector<32x8xf32>,
    %c0_4 = arith.constant 0 : index
    %c68 = arith.constant 68 : index
    %5 = vector.load %arg2[%c0_4, %c68] : memref<32x384xf32, #tpu.memory_space<vmem>>, vector<32x8xf32>
    tpu.vector_store %arg2[%c0_4, %c68], %2 {strides = array<i32>} : memref<32x384xf32, #tpu.memory_space<vmem>>, vector<32x8xf32>,
    %c0_5 = arith.constant 0 : index
    %c92 = arith.constant 92 : index
    %6 = vector.load %arg2[%c0_5, %c92] : memref<32x384xf32, #tpu.memory_space<vmem>>, vector<32x8xf32>
    tpu.vector_store %arg2[%c0_5, %c92], %2 {strides = array<i32>} : memref<32x384xf32, #tpu.memory_space<vmem>>, vector<32x8xf32>,
    %c0_6 = arith.constant 0 : index
    %c116 = arith.constant 116 : index
    %7 = vector.load %arg2[%c0_6, %c116] : memref<32x384xf32, #tpu.memory_space<vmem>>, vector<32x8xf32>
    tpu.vector_store %arg2[%c0_6, %c116], %2 {strides = array<i32>} : memref<32x384xf32, #tpu.memory_space<vmem>>, vector<32x8xf32>,
    %c0_7 = arith.constant 0 : index
    %c140 = arith.constant 140 : index
    %8 = vector.load %arg2[%c0_7, %c140] : memref<32x384xf32, #tpu.memory_space<vmem>>, vector<32x8xf32>
    tpu.vector_store %arg2[%c0_7, %c140], %2 {strides = array<i32>} : memref<32x384xf32, #tpu.memory_space<vmem>>, vector<32x8xf32>,
    %c0_8 = arith.constant 0 : index
    %c164 = arith.constant 164 : index
    %9 = vector.load %arg2[%c0_8, %c164] : memref<32x384xf32, #tpu.memory_space<vmem>>, vector<32x8xf32>
    tpu.vector_store %arg2[%c0_8, %c164], %2 {strides = array<i32>} : memref<32x384xf32, #tpu.memory_space<vmem>>, vector<32x8xf32>,
    %c0_9 = arith.constant 0 : index
    %c188 = arith.constant 188 : index
    %10 = vector.load %arg2[%c0_9, %c188] : memref<32x384xf32, #tpu.memory_space<vmem>>, vector<32x8xf32>
    tpu.vector_store %arg2[%c0_9, %c188], %2 {strides = array<i32>} : memref<32x384xf32, #tpu.memory_space<vmem>>, vector<32x8xf32>,
    %c0_10 = arith.constant 0 : index
    %c212 = arith.constant 212 : index
    %11 = vector.load %arg2[%c0_10, %c212] : memref<32x384xf32, #tpu.memory_space<vmem>>, vector<32x8xf32>
    tpu.vector_store %arg2[%c0_10, %c212], %2 {strides = array<i32>} : memref<32x384xf32, #tpu.memory_space<vmem>>, vector<32x8xf32>,
    %c0_11 = arith.constant 0 : index
    %c236 = arith.constant 236 : index
    %12 = vector.load %arg2[%c0_11, %c236] : memref<32x384xf32, #tpu.memory_space<vmem>>, vector<32x8xf32>
    tpu.vector_store %arg2[%c0_11, %c236], %2 {strides = array<i32>} : memref<32x384xf32, #tpu.memory_space<vmem>>, vector<32x8xf32>,
    %c0_12 = arith.constant 0 : index
    %c260 = arith.constant 260 : index
    %13 = vector.load %arg2[%c0_12, %c260] : memref<32x384xf32, #tpu.memory_space<vmem>>, vector<32x8xf32>
    tpu.vector_store %arg2[%c0_12, %c260], %2 {strides = array<i32>} : memref<32x384xf32, #tpu.memory_space<vmem>>, vector<32x8xf32>,
    %c0_13 = arith.constant 0 : index
    %c284 = arith.constant 284 : index
    %14 = vector.load %arg2[%c0_13, %c284] : memref<32x384xf32, #tpu.memory_space<vmem>>, vector<32x8xf32>
    tpu.vector_store %arg2[%c0_13, %c284], %2 {strides = array<i32>} : memref<32x384xf32, #tpu.memory_space<vmem>>, vector<32x8xf32>,
    %c0_14 = arith.constant 0 : index
    %c308 = arith.constant 308 : index
    %15 = vector.load %arg2[%c0_14, %c308] : memref<32x384xf32, #tpu.memory_space<vmem>>, vector<32x8xf32>
    tpu.vector_store %arg2[%c0_14, %c308], %2 {strides = array<i32>} : memref<32x384xf32, #tpu.memory_space<vmem>>, vector<32x8xf32>,
    %c0_15 = arith.constant 0 : index
    %c332 = arith.constant 332 : index
    %16 = vector.load %arg2[%c0_15, %c332] : memref<32x384xf32, #tpu.memory_space<vmem>>, vector<32x8xf32>
    tpu.vector_store %arg2[%c0_15, %c332], %2 {strides = array<i32>} : memref<32x384xf32, #tpu.memory_space<vmem>>, vector<32x8xf32>,
    %c0_16 = arith.constant 0 : index
    %c356 = arith.constant 356 : index
    %17 = vector.load %arg2[%c0_16, %c356] : memref<32x384xf32, #tpu.memory_space<vmem>>, vector<32x8xf32>
    tpu.vector_store %arg2[%c0_16, %c356], %2 {strides = array<i32>} : memref<32x384xf32, #tpu.memory_space<vmem>>, vector<32x8xf32>,
    %c0_17 = arith.constant 0 : index
    %c380 = arith.constant 380 : index
    %18 = vector.load %arg2[%c0_17, %c380] : memref<32x384xf32, #tpu.memory_space<vmem>>, vector<32x4xf32>
    tpu.vector_store %arg2[%c0_17, %c380], %0 {strides = array<i32>} : memref<32x384xf32, #tpu.memory_space<vmem>>, vector<32x4xf32>,
    %c0_18 = arith.constant 0 : index
    %c0_19 = arith.constant 0 : index
    %19 = vector.load %arg1[%c0_18, %c0_19] : memref<32x256xf32, #tpu.memory_space<vmem>>, vector<32x16xf32>
    %c0_20 = arith.constant 0 : index
    %c4 = arith.constant 4 : index
    %20 = vector.load %arg2[%c0_20, %c4] : memref<32x384xf32, #tpu.memory_space<vmem>>, vector<32x16xf32>
    tpu.vector_store %arg2[%c0_20, %c4], %19 {strides = array<i32>} : memref<32x384xf32, #tpu.memory_space<vmem>>, vector<32x16xf32>,
    %c0_21 = arith.constant 0 : index
    %c16 = arith.constant 16 : index
    %21 = vector.load %arg1[%c0_21, %c16] : memref<32x256xf32, #tpu.memory_space<vmem>>, vector<32x16xf32>
    %c0_22 = arith.constant 0 : index
    %c28 = arith.constant 28 : index
    %22 = vector.load %arg2[%c0_22, %c28] : memref<32x384xf32, #tpu.memory_space<vmem>>, vector<32x16xf32>
    tpu.vector_store %arg2[%c0_22, %c28], %21 {strides = array<i32>} : memref<32x384xf32, #tpu.memory_space<vmem>>, vector<32x16xf32>,
    %c0_23 = arith.constant 0 : index
    %c32 = arith.constant 32 : index
    %23 = vector.load %arg1[%c0_23, %c32] : memref<32x256xf32, #tpu.memory_space<vmem>>, vector<32x16xf32>
    %c0_24 = arith.constant 0 : index
    %c52 = arith.constant 52 : index
    %24 = vector.load %arg2[%c0_24, %c52] : memref<32x384xf32, #tpu.memory_space<vmem>>, vector<32x16xf32>
    tpu.vector_store %arg2[%c0_24, %c52], %23 {strides = array<i32>} : memref<32x384xf32, #tpu.memory_space<vmem>>, vector<32x16xf32>,
    %c0_25 = arith.constant 0 : index
    %c48 = arith.constant 48 : index
    %25 = vector.load %arg1[%c0_25, %c48] : memref<32x256xf32, #tpu.memory_space<vmem>>, vector<32x16xf32>
    %c0_26 = arith.constant 0 : index
    %c76 = arith.constant 76 : index
    %26 = vector.load %arg2[%c0_26, %c76] : memref<32x384xf32, #tpu.memory_space<vmem>>, vector<32x16xf32>
    tpu.vector_store %arg2[%c0_26, %c76], %25 {strides = array<i32>} : memref<32x384xf32, #tpu.memory_space<vmem>>, vector<32x16xf32>,
    %c0_27 = arith.constant 0 : index
    %c64 = arith.constant 64 : index
    %27 = vector.load %arg1[%c0_27, %c64] : memref<32x256xf32, #tpu.memory_space<vmem>>, vector<32x16xf32>
    %c0_28 = arith.constant 0 : index
    %c100 = arith.constant 100 : index
    %28 = vector.load %arg2[%c0_28, %c100] : memref<32x384xf32, #tpu.memory_space<vmem>>, vector<32x16xf32>
    tpu.vector_store %arg2[%c0_28, %c100], %27 {strides = array<i32>} : memref<32x384xf32, #tpu.memory_space<vmem>>, vector<32x16xf32>,
    %c0_29 = arith.constant 0 : index
    %c80 = arith.constant 80 : index
    %29 = vector.load %arg1[%c0_29, %c80] : memref<32x256xf32, #tpu.memory_space<vmem>>, vector<32x16xf32>
    %c0_30 = arith.constant 0 : index
    %c124 = arith.constant 124 : index
    %30 = vector.load %arg2[%c0_30, %c124] : memref<32x384xf32, #tpu.memory_space<vmem>>, vector<32x16xf32>
    tpu.vector_store %arg2[%c0_30, %c124], %29 {strides = array<i32>} : memref<32x384xf32, #tpu.memory_space<vmem>>, vector<32x16xf32>,
    %c0_31 = arith.constant 0 : index
    %c96 = arith.constant 96 : index
    %31 = vector.load %arg1[%c0_31, %c96] : memref<32x256xf32, #tpu.memory_space<vmem>>, vector<32x16xf32>
    %c0_32 = arith.constant 0 : index
    %c148 = arith.constant 148 : index
    %32 = vector.load %arg2[%c0_32, %c148] : memref<32x384xf32, #tpu.memory_space<vmem>>, vector<32x16xf32>
    tpu.vector_store %arg2[%c0_32, %c148], %31 {strides = array<i32>} : memref<32x384xf32, #tpu.memory_space<vmem>>, vector<32x16xf32>,
    %c0_33 = arith.constant 0 : index
    %c112 = arith.constant 112 : index
    %33 = vector.load %arg1[%c0_33, %c112] : memref<32x256xf32, #tpu.memory_space<vmem>>, vector<32x16xf32>
    %c0_34 = arith.constant 0 : index
    %c172 = arith.constant 172 : index
    %34 = vector.load %arg2[%c0_34, %c172] : memref<32x384xf32, #tpu.memory_space<vmem>>, vector<32x16xf32>
    tpu.vector_store %arg2[%c0_34, %c172], %33 {strides = array<i32>} : memref<32x384xf32, #tpu.memory_space<vmem>>, vector<32x16xf32>,
    %c0_35 = arith.constant 0 : index
    %c128 = arith.constant 128 : index
    %35 = vector.load %arg1[%c0_35, %c128] : memref<32x256xf32, #tpu.memory_space<vmem>>, vector<32x16xf32>
    %c0_36 = arith.constant 0 : index
    %c196 = arith.constant 196 : index
    %36 = vector.load %arg2[%c0_36, %c196] : memref<32x384xf32, #tpu.memory_space<vmem>>, vector<32x16xf32>
    tpu.vector_store %arg2[%c0_36, %c196], %35 {strides = array<i32>} : memref<32x384xf32, #tpu.memory_space<vmem>>, vector<32x16xf32>,
    %c0_37 = arith.constant 0 : index
    %c144 = arith.constant 144 : index
    %37 = vector.load %arg1[%c0_37, %c144] : memref<32x256xf32, #tpu.memory_space<vmem>>, vector<32x16xf32>
    %c0_38 = arith.constant 0 : index
    %c220 = arith.constant 220 : index
    %38 = vector.load %arg2[%c0_38, %c220] : memref<32x384xf32, #tpu.memory_space<vmem>>, vector<32x16xf32>
    tpu.vector_store %arg2[%c0_38, %c220], %37 {strides = array<i32>} : memref<32x384xf32, #tpu.memory_space<vmem>>, vector<32x16xf32>,
    %c0_39 = arith.constant 0 : index
    %c160 = arith.constant 160 : index
    %39 = vector.load %arg1[%c0_39, %c160] : memref<32x256xf32, #tpu.memory_space<vmem>>, vector<32x16xf32>
    %c0_40 = arith.constant 0 : index
    %c244 = arith.constant 244 : index
    %40 = vector.load %arg2[%c0_40, %c244] : memref<32x384xf32, #tpu.memory_space<vmem>>, vector<32x16xf32>
    tpu.vector_store %arg2[%c0_40, %c244], %39 {strides = array<i32>} : memref<32x384xf32, #tpu.memory_space<vmem>>, vector<32x16xf32>,
    %c0_41 = arith.constant 0 : index
    %c176 = arith.constant 176 : index
    %41 = vector.load %arg1[%c0_41, %c176] : memref<32x256xf32, #tpu.memory_space<vmem>>, vector<32x16xf32>
    %c0_42 = arith.constant 0 : index
    %c268 = arith.constant 268 : index
    %42 = vector.load %arg2[%c0_42, %c268] : memref<32x384xf32, #tpu.memory_space<vmem>>, vector<32x16xf32>
    tpu.vector_store %arg2[%c0_42, %c268], %41 {strides = array<i32>} : memref<32x384xf32, #tpu.memory_space<vmem>>, vector<32x16xf32>,
    %c0_43 = arith.constant 0 : index
    %c192 = arith.constant 192 : index
    %43 = vector.load %arg1[%c0_43, %c192] : memref<32x256xf32, #tpu.memory_space<vmem>>, vector<32x16xf32>
    %c0_44 = arith.constant 0 : index
    %c292 = arith.constant 292 : index
    %44 = vector.load %arg2[%c0_44, %c292] : memref<32x384xf32, #tpu.memory_space<vmem>>, vector<32x16xf32>
    tpu.vector_store %arg2[%c0_44, %c292], %43 {strides = array<i32>} : memref<32x384xf32, #tpu.memory_space<vmem>>, vector<32x16xf32>,
    %c0_45 = arith.constant 0 : index
    %c208 = arith.constant 208 : index
    %45 = vector.load %arg1[%c0_45, %c208] : memref<32x256xf32, #tpu.memory_space<vmem>>, vector<32x16xf32>
    %c0_46 = arith.constant 0 : index
    %c316 = arith.constant 316 : index
    %46 = vector.load %arg2[%c0_46, %c316] : memref<32x384xf32, #tpu.memory_space<vmem>>, vector<32x16xf32>
    tpu.vector_store %arg2[%c0_46, %c316], %45 {strides = array<i32>} : memref<32x384xf32, #tpu.memory_space<vmem>>, vector<32x16xf32>,
    %c0_47 = arith.constant 0 : index
    %c224 = arith.constant 224 : index
    %47 = vector.load %arg1[%c0_47, %c224] : memref<32x256xf32, #tpu.memory_space<vmem>>, vector<32x16xf32>
    %c0_48 = arith.constant 0 : index
    %c340 = arith.constant 340 : index
    %48 = vector.load %arg2[%c0_48, %c340] : memref<32x384xf32, #tpu.memory_space<vmem>>, vector<32x16xf32>
    tpu.vector_store %arg2[%c0_48, %c340], %47 {strides = array<i32>} : memref<32x384xf32, #tpu.memory_space<vmem>>, vector<32x16xf32>,
    %c0_49 = arith.constant 0 : index
    %c240 = arith.constant 240 : index
    %49 = vector.load %arg1[%c0_49, %c240] : memref<32x256xf32, #tpu.memory_space<vmem>>, vector<32x16xf32>
    %c0_50 = arith.constant 0 : index
    %c364 = arith.constant 364 : index
    %50 = vector.load %arg2[%c0_50, %c364] : memref<32x384xf32, #tpu.memory_space<vmem>>, vector<32x16xf32>
    tpu.vector_store %arg2[%c0_50, %c364], %49 {strides = array<i32>} : memref<32x384xf32, #tpu.memory_space<vmem>>, vector<32x16xf32>,
    return
  }
  func.func @transform_0(%arg0: i32) -> (i32, i32) {
    %c0_i32 = arith.constant 0 : i32
    %c0_i32_0 = arith.constant 0 : i32
    return %arg0, %c0_i32 : i32, i32
  }
  func.func @transform_1(%arg0: i32) -> (i32, i32) {
    %c0_i32 = arith.constant 0 : i32
    %c0_i32_0 = arith.constant 0 : i32
    return %arg0, %c0_i32 : i32, i32
  }
}

</mosaic_0001>

<bundles_post_ra>
// kernel: tpu_custom_call.1
= control target key start
LH: loop header
LB: loop body
LE: loop exit
PB: predicated region body
PF: predicated region fallthrough
CT: control target
= control target key end

     0   :  { %6 = vsyncpa [#allocation3], 0  ;;  %s795_s0 = inlined_call_operand.hbm [shape: f32[8,256], index: 0, kind: input, shape index: {}]   ;;  %s796_s1 = inlined_call_operand.hbm [shape: f32[8,384], index: 1, kind: output, shape index: {}]  }
   0x1   :  { %7 = vsyncpa [#allocation4], 0 }
   0x2   :  { %12 = vsyncadd [#allocation3], 768  ;;  %s600_s6 = smov [#allocation2]  }
   0x3   :  { %s13_s7 = sshll.u32 %s600_s6, 4  ;;  %s14_s7 = int_to_ptr.vmem [resolvable:$true] %s13_s7 }
   0x4   :  { %s564_s8 = scalar_lea.vmem %s14_s7, 256  ;;  %s568_s9 = scalar_lea.vmem %s14_s7, 1024 }
   0x5   :  { %p565_p0 = scmp.ne.s32.totalorder %s14_s7, %s564_s8  ;;  %p569_p1 = scmp.lt.s32.totalorder %s14_s7, %s14_s7 }
   0x6   :  { %p570_p2 = scmp.lt.s32.totalorder %s568_s9, %s564_s8 }
   0x8   :  { %p571_p3 = por %p570_p2, %p569_p1 }
   0xa   :  { %p572_p4 = pnand %p571_p3, %p565_p0 }
   0xc   :  { %575 = shalt.err (!%p572_p4)
}
   0xd   :  { %s601_s10 = smov 256   ;;  %s602_s11 = smov 16  }
   0xe   :  { %19 = dma.hbm_to_vmem [thread:$0]  %s795_s0, 256, %s14_s7, [#allocation3], %s601_s10, %s601_s10, %s602_s11  }
   0xf   :  { %596 = dma.done.wait [#allocation3], 1024  }
  0x10   :  { %597 = vsyncadd [#allocation3], 4294966272  ;;  %vm23_vm0 = vcmask 31744   ;;  %vm28_vm1 = vcmask 228512   ;;  %vm33_vm2 = vcmask 425312   ;;  %vm38_vm3 = vcmask 622112  }
  0x11   :  { %v603_v0 = vmov 0.0   ;;  %vm43_vm4 = vcmask 818912   ;;  %vm48_vm5 = vcmask 1015712   ;;  %v680_v1 = vld [vmem:[#allocation2 + $0x20] sm:$0xff]  ;;  %s604_s0 = smov 4   ;;  %v686_v3 = vld [vmem:[#allocation2 + $0x30] sm:$0xff] }
  0x12   :  { %26 = vst.msk [vmem:[#allocation5 + $0x30] sm:$0xff] %vm23_vm0, %v603_v0  ;;  %24 = vst.msk [vmem:[#allocation5] sm:$0xff] %vm23_vm0, %v603_v0  ;;  %v682_v2 = vld [vmem:[#allocation2] sm:$0xff]  ;;  %120 = vrot.lane.b32.xlu1 %v680_v1, %s604_s0  ;;  %v688_v4 = vld [vmem:[#allocation2 + $0x10] sm:$0xff]  ;;  %s605_s14 = smov 12   ;;  %s606_s15 = smov 20  }
  0x13   :  { %25 = vst.msk [vmem:[#allocation5 + $0x18] sm:$0xff] %vm23_vm0, %v603_v0  ;;  %27 = vst.msk [vmem:[#allocation5 + $0x48] sm:$0xff] %vm23_vm0, %v603_v0  ;;  %116 = vrot.lane.b32.xlu0 %v682_v2, %s604_s0  ;;  %vm53_vm6 = vcmask 162912   ;;  %vm58_vm7 = vcmask 359712   ;;  %vm63_vm8 = vcmask 556512   ;;  %vm68_vm9 = vcmask 753312  }
  0x14   :  { %31 = vst.msk [vmem:[#allocation5 + $0x30] sm:$0xff] %vm28_vm1, %v603_v0  ;;  %29 = vst.msk [vmem:[#allocation5] sm:$0xff] %vm28_vm1, %v603_v0  ;;  %vm73_vm10 = vcmask 950112   ;;  %s607_s16 = smov 28   ;;  %s608_s17 = smov 36   ;;  %vm78_vm11 = vcmask 97312  }
  0x15   :  { %30 = vst.msk [vmem:[#allocation5 + $0x18] sm:$0xff] %vm28_vm1, %v603_v0  ;;  %32 = vst.msk [vmem:[#allocation5 + $0x48] sm:$0xff] %vm28_vm1, %v603_v0  ;;  %s609_s18 = smov 44   ;;  %vm83_vm12 = vcmask 294112   ;;  %vm88_vm13 = vcmask 490912   ;;  %vm93_vm14 = vcmask 687712  }
  0x16   :  { %36 = vst.msk [vmem:[#allocation5 + $0x30] sm:$0xff] %vm33_vm2, %v603_v0  ;;  %34 = vst.msk [vmem:[#allocation5] sm:$0xff] %vm33_vm2, %v603_v0  ;;  %122 = vrot.lane.b32.xlu1 %v686_v3, %s604_s0  ;;  %vm98_vm15 = vcmask 884512   ;;  %s610_s19 = smov 52   ;;  %vm103_vm1 = vcmask 1048544   ;;  %s611_s20 = smov 60  }
  0x17   :  { %35 = vst.msk [vmem:[#allocation5 + $0x18] sm:$0xff] %vm33_vm2, %v603_v0  ;;  %37 = vst.msk [vmem:[#allocation5 + $0x48] sm:$0xff] %vm33_vm2, %v603_v0  ;;  %118 = vrot.lane.b32.xlu0 %v688_v4, %s604_s0  ;;  %v362_v5 = vld [vmem:[#allocation2 + $0x8] sm:$0xff]  ;;  %s612_s21 = smov 84   ;;  %s613_s22 = smov 68   ;;  %v363_v7 = vld [vmem:[#allocation2 + $0x18] sm:$0xff] }
  0x18   :  { %41 = vst.msk [vmem:[#allocation5 + $0x30] sm:$0xff] %vm38_vm3, %v603_v0  ;;  %39 = vst.msk [vmem:[#allocation5] sm:$0xff] %vm38_vm3, %v603_v0  ;;  %v364_v6 = vld [vmem:[#allocation2 + $0x28] sm:$0xff]  ;;  %v365_v8 = vld [vmem:[#allocation2 + $0x38] sm:$0xff]  ;;  %s614_s23 = smov 92   ;;  %s615_s24 = smov 100  }
  0x19   :  { %40 = vst.msk [vmem:[#allocation5 + $0x18] sm:$0xff] %vm38_vm3, %v603_v0  ;;  %42 = vst.msk [vmem:[#allocation5 + $0x48] sm:$0xff] %vm38_vm3, %v603_v0  ;;  %s616_s25 = smov 108   ;;  %s617_s26 = smov 76   ;;  %vm128_vm2 = vcmask 162848   ;;  %vm153_vm3 = vcmask 359648  }
  0x1a   :  { %46 = vst.msk [vmem:[#allocation5 + $0x30] sm:$0xff] %vm43_vm4, %v603_v0  ;;  %44 = vst.msk [vmem:[#allocation5] sm:$0xff] %vm43_vm4, %v603_v0  ;;  %143 = vrot.lane.b32.xlu1 %v688_v4, %s605_s14  ;;  %s618_s27 = smov 116   ;;  %s619_s28 = smov 124  }
  0x1b   :  { %47 = vst.msk [vmem:[#allocation5 + $0x48] sm:$0xff] %vm43_vm4, %v603_v0  ;;  %45 = vst.msk [vmem:[#allocation5 + $0x18] sm:$0xff] %vm43_vm4, %v603_v0  ;;  %141 = vrot.lane.b32.xlu0 %v682_v2, %s605_s14  ;;  %vm178_vm4 = vcmask 556448  }
  0x1c   :  { %51 = vst.msk [vmem:[#allocation5 + $0x30] sm:$0xff] %vm48_vm5, %v603_v0  ;;  %49 = vst.msk [vmem:[#allocation5] sm:$0xff] %vm48_vm5, %v603_v0 }
  0x1d   :  { %52 = vst.msk [vmem:[#allocation5 + $0x48] sm:$0xff] %vm48_vm5, %v603_v0  ;;  %50 = vst.msk [vmem:[#allocation5 + $0x18] sm:$0xff] %vm48_vm5, %v603_v0  ;;  %vm203_vm5 = vcmask 753248  }
  0x1e   :  { %147 = vrot.lane.b32.xlu1 %v686_v3, %s605_s14  ;;  %55 = vst.msk [vmem:[#allocation5 + $0x20] sm:$0xff] %vm53_vm6, %v603_v0  ;;  %54 = vst.msk [vmem:[#allocation5 + $0x8] sm:$0xff] %vm53_vm6, %v603_v0 }
  0x1f   :  { %145 = vrot.lane.b32.xlu0 %v680_v1, %s605_s14  ;;  %56 = vst.msk [vmem:[#allocation5 + $0x38] sm:$0xff] %vm53_vm6, %v603_v0  ;;  %57 = vst.msk [vmem:[#allocation5 + $0x50] sm:$0xff] %vm53_vm6, %v603_v0  ;;  %vm228_vm6 = vcmask 950048  }
  0x20   :  { %60 = vst.msk [vmem:[#allocation5 + $0x20] sm:$0xff] %vm58_vm7, %v603_v0  ;;  %59 = vst.msk [vmem:[#allocation5 + $0x8] sm:$0xff] %vm58_vm7, %v603_v0 }
  0x21   :  { %61 = vst.msk [vmem:[#allocation5 + $0x38] sm:$0xff] %vm58_vm7, %v603_v0  ;;  %62 = vst.msk [vmem:[#allocation5 + $0x50] sm:$0xff] %vm58_vm7, %v603_v0  ;;  %vm254_vm7 = vcmask 97280  }
  0x22   :  { %168 = vrot.lane.b32.xlu1 %v688_v4, %s606_s15  ;;  %65 = vst.msk [vmem:[#allocation5 + $0x20] sm:$0xff] %vm63_vm8, %v603_v0  ;;  %64 = vst.msk [vmem:[#allocation5 + $0x8] sm:$0xff] %vm63_vm8, %v603_v0 }
  0x23   :  { %166 = vrot.lane.b32.xlu0 %v682_v2, %s606_s15  ;;  %67 = vst.msk [vmem:[#allocation5 + $0x50] sm:$0xff] %vm63_vm8, %v603_v0  ;;  %66 = vst.msk [vmem:[#allocation5 + $0x38] sm:$0xff] %vm63_vm8, %v603_v0  ;;  %vm282_vm8 = vcmask 294048  }
  0x24   :  { %70 = vst.msk [vmem:[#allocation5 + $0x20] sm:$0xff] %vm68_vm9, %v603_v0  ;;  %69 = vst.msk [vmem:[#allocation5 + $0x8] sm:$0xff] %vm68_vm9, %v603_v0 }
  0x25   :  { %72 = vst.msk [vmem:[#allocation5 + $0x50] sm:$0xff] %vm68_vm9, %v603_v0  ;;  %71 = vst.msk [vmem:[#allocation5 + $0x38] sm:$0xff] %vm68_vm9, %v603_v0  ;;  %vm307_vm9 = vcmask 490848  }
  0x26   :  { %172 = vrot.lane.b32.xlu1 %v686_v3, %s606_s15  ;;  %75 = vst.msk [vmem:[#allocation5 + $0x20] sm:$0xff] %vm73_vm10, %v603_v0  ;;  %74 = vst.msk [vmem:[#allocation5 + $0x8] sm:$0xff] %vm73_vm10, %v603_v0 }
  0x27   :  { %170 = vrot.lane.b32.xlu0 %v680_v1, %s606_s15  ;;  %77 = vst.msk [vmem:[#allocation5 + $0x50] sm:$0xff] %vm73_vm10, %v603_v0  ;;  %76 = vst.msk [vmem:[#allocation5 + $0x38] sm:$0xff] %vm73_vm10, %v603_v0  ;;  %vm332_vm10 = vcmask 687648  }
  0x28   :  { %79 = vst.msk [vmem:[#allocation5 + $0x10] sm:$0xff] %vm78_vm11, %v603_v0  ;;  %80 = vst.msk [vmem:[#allocation5 + $0x28] sm:$0xff] %vm78_vm11, %v603_v0 }
  0x29   :  { %81 = vst.msk [vmem:[#allocation5 + $0x40] sm:$0xff] %vm78_vm11, %v603_v0  ;;  %82 = vst.msk [vmem:[#allocation5 + $0x58] sm:$0xff] %vm78_vm11, %v603_v0  ;;  %vm411_vm11 = vcmask 228448  }
  0x2a   :  { %193 = vrot.lane.b32.xlu1 %v688_v4, %s607_s16  ;;  %84 = vst.msk [vmem:[#allocation5 + $0x10] sm:$0xff] %vm83_vm12, %v603_v0  ;;  %85 = vst.msk [vmem:[#allocation5 + $0x28] sm:$0xff] %vm83_vm12, %v603_v0 }
  0x2b   :  { %191 = vrot.lane.b32.xlu0 %v682_v2, %s607_s16  ;;  %86 = vst.msk [vmem:[#allocation5 + $0x40] sm:$0xff] %vm83_vm12, %v603_v0  ;;  %87 = vst.msk [vmem:[#allocation5 + $0x58] sm:$0xff] %vm83_vm12, %v603_v0  ;;  %vm436_vm12 = vcmask 425248  }
  0x2c   :  { %89 = vst.msk [vmem:[#allocation5 + $0x10] sm:$0xff] %vm88_vm13, %v603_v0  ;;  %91 = vst.msk [vmem:[#allocation5 + $0x40] sm:$0xff] %vm88_vm13, %v603_v0 }
  0x2d   :  { %90 = vst.msk [vmem:[#allocation5 + $0x28] sm:$0xff] %vm88_vm13, %v603_v0  ;;  %92 = vst.msk [vmem:[#allocation5 + $0x58] sm:$0xff] %vm88_vm13, %v603_v0  ;;  %vm357_vm13 = vcmask 884448  }
  0x2e   :  { %197 = vrot.lane.b32.xlu1 %v686_v3, %s607_s16  ;;  %94 = vst.msk [vmem:[#allocation5 + $0x10] sm:$0xff] %vm93_vm14, %v603_v0  ;;  %96 = vst.msk [vmem:[#allocation5 + $0x40] sm:$0xff] %vm93_vm14, %v603_v0 }
  0x2f   :  { %195 = vrot.lane.b32.xlu0 %v680_v1, %s607_s16  ;;  %95 = vst.msk [vmem:[#allocation5 + $0x28] sm:$0xff] %vm93_vm14, %v603_v0  ;;  %97 = vst.msk [vmem:[#allocation5 + $0x58] sm:$0xff] %vm93_vm14, %v603_v0  ;;  %vm382_vm14 = vcmask 1048480  }
  0x30   :  { %99 = vst.msk [vmem:[#allocation5 + $0x10] sm:$0xff] %vm98_vm15, %v603_v0  ;;  %101 = vst.msk [vmem:[#allocation5 + $0x40] sm:$0xff] %vm98_vm15, %v603_v0 }
  0x31   :  { %100 = vst.msk [vmem:[#allocation5 + $0x28] sm:$0xff] %vm98_vm15, %v603_v0  ;;  %102 = vst.msk [vmem:[#allocation5 + $0x58] sm:$0xff] %vm98_vm15, %v603_v0  ;;  %vm486_vm15 = vcmask 818848  }
  0x32   :  { %218 = vrot.lane.b32.xlu1 %v688_v4, %s608_s17  ;;  %104 = vst.msk [vmem:[#allocation5 + $0x10] sm:$0xff] %vm103_vm1, %v603_v0  ;;  %106 = vst.msk [vmem:[#allocation5 + $0x40] sm:$0xff] %vm103_vm1, %v603_v0 }
  0x33   :  { %216 = vrot.lane.b32.xlu0 %v682_v2, %s608_s17  ;;  %105 = vst.msk [vmem:[#allocation5 + $0x28] sm:$0xff] %vm103_vm1, %v603_v0  ;;  %107 = vst.msk [vmem:[#allocation5 + $0x58] sm:$0xff] %vm103_vm1, %v603_v0 }
  0x36   :  { %222 = vrot.lane.b32.xlu1 %v686_v3, %s608_s17 }
  0x37   :  { %220 = vrot.lane.b32.xlu0 %v680_v1, %s608_s17 }
  0x3a   :  { %243 = vrot.lane.b32.xlu1 %v688_v4, %s609_s18 }
  0x3b   :  { %241 = vrot.lane.b32.xlu0 %v682_v2, %s609_s18 }
  0x3e   :  { %247 = vrot.lane.b32.xlu1 %v686_v3, %s609_s18 }
  0x3f   :  { %245 = vrot.lane.b32.xlu0 %v680_v1, %s609_s18 }
  0x42   :  { %272 = vrot.lane.b32.xlu1 %v688_v4, %s610_s19 }
  0x43   :  { %270 = vrot.lane.b32.xlu0 %v682_v2, %s610_s19 }
  0x46   :  { %276 = vrot.lane.b32.xlu1 %v686_v3, %s610_s19 }
  0x47   :  { %274 = vrot.lane.b32.xlu0 %v680_v1, %s610_s19 }
  0x4a   :  { %297 = vrot.lane.b32.xlu1 %v688_v4, %s611_s20 }
  0x4b   :  { %295 = vrot.lane.b32.xlu0 %v682_v2, %s611_s20 }
  0x4e   :  { %301 = vrot.lane.b32.xlu1 %v686_v3, %s611_s20 }
  0x4f   :  { %299 = vrot.lane.b32.xlu0 %v680_v1, %s611_s20 }
  0x52   :  { %370 = vrot.lane.b32.xlu1 %v362_v5, %s612_s21 }
  0x53   :  { %320 = vrot.lane.b32.xlu0 %v362_v5, %s613_s22 }
  0x56   :  { %374 = vrot.lane.b32.xlu1 %v364_v6, %s612_s21 }
  0x57   :  { %372 = vrot.lane.b32.xlu0 %v363_v7, %s612_s21 }
  0x5a   :  { %399 = vrot.lane.b32.xlu1 %v362_v5, %s614_s23 }
  0x5b   :  { %376 = vrot.lane.b32.xlu0 %v365_v8, %s612_s21 }
  0x5e   :  { %403 = vrot.lane.b32.xlu1 %v364_v6, %s614_s23 }
  0x5f   :  { %401 = vrot.lane.b32.xlu0 %v363_v7, %s614_s23 }
  0x62   :  { %424 = vrot.lane.b32.xlu1 %v362_v5, %s615_s24 }
  0x63   :  { %405 = vrot.lane.b32.xlu0 %v365_v8, %s614_s23 }
  0x66   :  { %428 = vrot.lane.b32.xlu1 %v364_v6, %s615_s24 }
  0x67   :  { %426 = vrot.lane.b32.xlu0 %v363_v7, %s615_s24 }
  0x6a   :  { %322 = vrot.lane.b32.xlu1 %v363_v7, %s613_s22 }
  0x6b   :  { %430 = vrot.lane.b32.xlu0 %v365_v8, %s615_s24 }
  0x6e   :  { %326 = vrot.lane.b32.xlu1 %v365_v8, %s613_s22 }
  0x6f   :  { %324 = vrot.lane.b32.xlu0 %v364_v6, %s613_s22 }
  0x72   :  { %451 = vrot.lane.b32.xlu1 %v363_v7, %s616_s25 }
  0x73   :  { %449 = vrot.lane.b32.xlu0 %v362_v5, %s616_s25 }
  0x76   :  { %455 = vrot.lane.b32.xlu1 %v365_v8, %s616_s25 }
  0x77   :  { %453 = vrot.lane.b32.xlu0 %v364_v6, %s616_s25 }
  0x7a   :  { %347 = vrot.lane.b32.xlu1 %v363_v7, %s617_s26 }
  0x7b   :  { %345 = vrot.lane.b32.xlu0 %v362_v5, %s617_s26 }
  0x7e   :  { %351 = vrot.lane.b32.xlu1 %v365_v8, %s617_s26 }
  0x7f   :  { %349 = vrot.lane.b32.xlu0 %v364_v6, %s617_s26 }
  0x82   :  { %476 = vrot.lane.b32.xlu1 %v363_v7, %s618_s27 }
  0x83   :  { %474 = vrot.lane.b32.xlu0 %v362_v5, %s618_s27 }
  0x84   :  { %v121_v9 = vpop.permute.xlu1 %120 }
  0x85   :  { %v117_v10 = vpop.permute.xlu0 %116  ;;  %131 = vst.msk [vmem:[#allocation5 + $0x30] sm:$0xff] %vm128_vm2, %v121_v9 }
  0x86   :  { %129 = vst.msk [vmem:[#allocation5] sm:$0xff] %vm128_vm2, %v117_v10  ;;  %480 = vrot.lane.b32.xlu1 %v365_v8, %s618_s27 }
  0x87   :  { %478 = vrot.lane.b32.xlu0 %v364_v6, %s618_s27 }
  0x88   :  { %v123_v11 = vpop.permute.xlu1 %122 }
  0x89   :  { %v119_v12 = vpop.permute.xlu0 %118  ;;  %132 = vst.msk [vmem:[#allocation5 + $0x48] sm:$0xff] %vm128_vm2, %v123_v11 }
  0x8a   :  { %130 = vst.msk [vmem:[#allocation5 + $0x18] sm:$0xff] %vm128_vm2, %v119_v12  ;;  %501 = vrot.lane.b32.xlu1 %v363_v7, %s619_s28 }
  0x8b   :  { %499 = vrot.lane.b32.xlu0 %v362_v5, %s619_s28 }
  0x8c   :  { %v144_v13 = vpop.permute.xlu1 %143 }
  0x8d   :  { %v142_v14 = vpop.permute.xlu0 %141  ;;  %155 = vst.msk [vmem:[#allocation5 + $0x18] sm:$0xff] %vm153_vm3, %v144_v13 }
  0x8e   :  { %154 = vst.msk [vmem:[#allocation5] sm:$0xff] %vm153_vm3, %v142_v14  ;;  %505 = vrot.lane.b32.xlu1 %v365_v8, %s619_s28 }
  0x8f   :  { %503 = vrot.lane.b32.xlu0 %v364_v6, %s619_s28 }
  0x90   :  { %v148_v15 = vpop.permute.xlu1 %147 }
  0x91   :  { %v146_v16 = vpop.permute.xlu0 %145  ;;  %157 = vst.msk [vmem:[#allocation5 + $0x48] sm:$0xff] %vm153_vm3, %v148_v15 }
  0x92   :  { %156 = vst.msk [vmem:[#allocation5 + $0x30] sm:$0xff] %vm153_vm3, %v146_v16 }
  0x94   :  { %v169_v17 = vpop.permute.xlu1 %168 }
  0x95   :  { %v167_v18 = vpop.permute.xlu0 %166  ;;  %180 = vst.msk [vmem:[#allocation5 + $0x18] sm:$0xff] %vm178_vm4, %v169_v17 }
  0x96   :  { %179 = vst.msk [vmem:[#allocation5] sm:$0xff] %vm178_vm4, %v167_v18 }
  0x98   :  { %v173_v19 = vpop.permute.xlu1 %172 }
  0x99   :  { %v171_v20 = vpop.permute.xlu0 %170  ;;  %182 = vst.msk [vmem:[#allocation5 + $0x48] sm:$0xff] %vm178_vm4, %v173_v19 }
  0x9a   :  { %181 = vst.msk [vmem:[#allocation5 + $0x30] sm:$0xff] %vm178_vm4, %v171_v20 }
  0x9c   :  { %v194_v21 = vpop.permute.xlu1 %193 }
  0x9d   :  { %v192_v22 = vpop.permute.xlu0 %191  ;;  %205 = vst.msk [vmem:[#allocation5 + $0x18] sm:$0xff] %vm203_vm5, %v194_v21 }
  0x9e   :  { %204 = vst.msk [vmem:[#allocation5] sm:$0xff] %vm203_vm5, %v192_v22 }
  0xa0   :  { %v198_v23 = vpop.permute.xlu1 %197 }
  0xa1   :  { %v196_v24 = vpop.permute.xlu0 %195  ;;  %207 = vst.msk [vmem:[#allocation5 + $0x48] sm:$0xff] %vm203_vm5, %v198_v23 }
  0xa2   :  { %206 = vst.msk [vmem:[#allocation5 + $0x30] sm:$0xff] %vm203_vm5, %v196_v24 }
  0xa4   :  { %v219_v25 = vpop.permute.xlu1 %218 }
  0xa5   :  { %v217_v26 = vpop.permute.xlu0 %216  ;;  %230 = vst.msk [vmem:[#allocation5 + $0x18] sm:$0xff] %vm228_vm6, %v219_v25 }
  0xa6   :  { %229 = vst.msk [vmem:[#allocation5] sm:$0xff] %vm228_vm6, %v217_v26 }
  0xa8   :  { %v223_v27 = vpop.permute.xlu1 %222 }
  0xa9   :  { %v221_v28 = vpop.permute.xlu0 %220  ;;  %232 = vst.msk [vmem:[#allocation5 + $0x48] sm:$0xff] %vm228_vm6, %v223_v27 }
  0xaa   :  { %231 = vst.msk [vmem:[#allocation5 + $0x30] sm:$0xff] %vm228_vm6, %v221_v28 }
  0xac   :  { %v244_v29 = vpop.permute.xlu1 %243 }
  0xad   :  { %v242_v30 = vpop.permute.xlu0 %241  ;;  %256 = vst.msk [vmem:[#allocation5 + $0x18] sm:$0xff] %vm103_vm1, %v244_v29 }
  0xae   :  { %257 = vst.msk [vmem:[#allocation5 + $0x20] sm:$0xff] %vm254_vm7, %v244_v29  ;;  %255 = vst.msk [vmem:[#allocation5 + $0x8] sm:$0xff] %vm254_vm7, %v242_v30 }
  0xaf   :  { %253 = vst.msk [vmem:[#allocation5] sm:$0xff] %vm103_vm1, %v242_v30 }
  0xb0   :  { %v248_v31 = vpop.permute.xlu1 %247 }
  0xb1   :  { %v246_v32 = vpop.permute.xlu0 %245  ;;  %260 = vst.msk [vmem:[#allocation5 + $0x48] sm:$0xff] %vm103_vm1, %v248_v31 }
  0xb2   :  { %261 = vst.msk [vmem:[#allocation5 + $0x50] sm:$0xff] %vm254_vm7, %v248_v31  ;;  %259 = vst.msk [vmem:[#allocation5 + $0x38] sm:$0xff] %vm254_vm7, %v246_v32 }
  0xb3   :  { %258 = vst.msk [vmem:[#allocation5 + $0x30] sm:$0xff] %vm103_vm1, %v246_v32  ;;  %vm511_vm1 = vcmask 1015648  }
  0xb4   :  { %v273_v33 = vpop.permute.xlu1 %272 }
  0xb5   :  { %v271_v34 = vpop.permute.xlu0 %270  ;;  %284 = vst.msk [vmem:[#allocation5 + $0x20] sm:$0xff] %vm282_vm8, %v273_v33 }
  0xb6   :  { %283 = vst.msk [vmem:[#allocation5 + $0x8] sm:$0xff] %vm282_vm8, %v271_v34 }
  0xb8   :  { %v277_v35 = vpop.permute.xlu1 %276 }
  0xb9   :  { %v275_v36 = vpop.permute.xlu0 %274  ;;  %286 = vst.msk [vmem:[#allocation5 + $0x50] sm:$0xff] %vm282_vm8, %v277_v35 }
  0xba   :  { %285 = vst.msk [vmem:[#allocation5 + $0x38] sm:$0xff] %vm282_vm8, %v275_v36 }
  0xbc   :  { %v298_v37 = vpop.permute.xlu1 %297 }
  0xbd   :  { %v296_v38 = vpop.permute.xlu0 %295  ;;  %309 = vst.msk [vmem:[#allocation5 + $0x20] sm:$0xff] %vm307_vm9, %v298_v37 }
  0xbe   :  { %308 = vst.msk [vmem:[#allocation5 + $0x8] sm:$0xff] %vm307_vm9, %v296_v38 }
  0xc0   :  { %v302_v39 = vpop.permute.xlu1 %301 }
  0xc1   :  { %v300_v40 = vpop.permute.xlu0 %299  ;;  %311 = vst.msk [vmem:[#allocation5 + $0x50] sm:$0xff] %vm307_vm9, %v302_v39 }
  0xc2   :  { %310 = vst.msk [vmem:[#allocation5 + $0x38] sm:$0xff] %vm307_vm9, %v300_v40 }
  0xc4   :  { %v371_v41 = vpop.permute.xlu1 %370 }
  0xc5   :  { %v321_v42 = vpop.permute.xlu0 %320  ;;  %384 = vst.msk [vmem:[#allocation5 + $0x10] sm:$0xff] %vm23_vm0, %v371_v41 }
  0xc6   :  { %333 = vst.msk [vmem:[#allocation5 + $0x8] sm:$0xff] %vm332_vm10, %v321_v42 }
  0xc8   :  { %v375_v43 = vpop.permute.xlu1 %374 }
  0xc9   :  { %v373_v44 = vpop.permute.xlu0 %372  ;;  %388 = vst.msk [vmem:[#allocation5 + $0x40] sm:$0xff] %vm23_vm0, %v375_v43 }
  0xca   :  { %386 = vst.msk [vmem:[#allocation5 + $0x28] sm:$0xff] %vm23_vm0, %v373_v44 }
  0xcc   :  { %v400_v45 = vpop.permute.xlu1 %399 }
  0xcd   :  { %v377_v46 = vpop.permute.xlu0 %376  ;;  %412 = vst.msk [vmem:[#allocation5 + $0x10] sm:$0xff] %vm411_vm11, %v400_v45 }
  0xce   :  { %390 = vst.msk [vmem:[#allocation5 + $0x58] sm:$0xff] %vm23_vm0, %v377_v46  ;;  %vm461_vm0 = vcmask 622048  }
  0xd0   :  { %v404_v47 = vpop.permute.xlu1 %403 }
  0xd1   :  { %v402_v48 = vpop.permute.xlu0 %401  ;;  %414 = vst.msk [vmem:[#allocation5 + $0x40] sm:$0xff] %vm411_vm11, %v404_v47 }
  0xd2   :  { %413 = vst.msk [vmem:[#allocation5 + $0x28] sm:$0xff] %vm411_vm11, %v402_v48 }
  0xd4   :  { %v425_v49 = vpop.permute.xlu1 %424 }
  0xd5   :  { %v406_v50 = vpop.permute.xlu0 %405  ;;  %437 = vst.msk [vmem:[#allocation5 + $0x10] sm:$0xff] %vm436_vm12, %v425_v49 }
  0xd6   :  { %415 = vst.msk [vmem:[#allocation5 + $0x58] sm:$0xff] %vm411_vm11, %v406_v50 }
  0xd8   :  { %v429_v51 = vpop.permute.xlu1 %428 }
  0xd9   :  { %v427_v52 = vpop.permute.xlu0 %426  ;;  %439 = vst.msk [vmem:[#allocation5 + $0x40] sm:$0xff] %vm436_vm12, %v429_v51 }
  0xda   :  { %438 = vst.msk [vmem:[#allocation5 + $0x28] sm:$0xff] %vm436_vm12, %v427_v52 }
  0xdc   :  { %v323_v53 = vpop.permute.xlu1 %322 }
  0xdd   :  { %v431_v54 = vpop.permute.xlu0 %430  ;;  %334 = vst.msk [vmem:[#allocation5 + $0x20] sm:$0xff] %vm332_vm10, %v323_v53 }
  0xde   :  { %440 = vst.msk [vmem:[#allocation5 + $0x58] sm:$0xff] %vm436_vm12, %v431_v54 }
  0xe0   :  { %v327_v55 = vpop.permute.xlu1 %326 }
  0xe1   :  { %v325_v56 = vpop.permute.xlu0 %324  ;;  %336 = vst.msk [vmem:[#allocation5 + $0x50] sm:$0xff] %vm332_vm10, %v327_v55 }
  0xe2   :  { %335 = vst.msk [vmem:[#allocation5 + $0x38] sm:$0xff] %vm332_vm10, %v325_v56 }
  0xe4   :  { %v452_v57 = vpop.permute.xlu1 %451 }
  0xe5   :  { %v450_v58 = vpop.permute.xlu0 %449  ;;  %463 = vst.msk [vmem:[#allocation5 + $0x28] sm:$0xff] %vm461_vm0, %v452_v57 }
  0xe6   :  { %462 = vst.msk [vmem:[#allocation5 + $0x10] sm:$0xff] %vm461_vm0, %v450_v58 }
  0xe8   :  { %v456_v59 = vpop.permute.xlu1 %455 }
  0xe9   :  { %v454_v60 = vpop.permute.xlu0 %453  ;;  %465 = vst.msk [vmem:[#allocation5 + $0x58] sm:$0xff] %vm461_vm0, %v456_v59 }
  0xea   :  { %464 = vst.msk [vmem:[#allocation5 + $0x40] sm:$0xff] %vm461_vm0, %v454_v60 }
  0xec   :  { %v348_v61 = vpop.permute.xlu1 %347 }
  0xed   :  { %v346_v62 = vpop.permute.xlu0 %345  ;;  %359 = vst.msk [vmem:[#allocation5 + $0x20] sm:$0xff] %vm357_vm13, %v348_v61 }
  0xee   :  { %358 = vst.msk [vmem:[#allocation5 + $0x8] sm:$0xff] %vm357_vm13, %v346_v62 }
  0xef   :  { %385 = vst.msk [vmem:[#allocation5 + $0x20] sm:$0xff] %vm382_vm14, %v373_v44  ;;  %383 = vst.msk [vmem:[#allocation5 + $0x8] sm:$0xff] %vm382_vm14, %v371_v41 }
  0xf0   :  { %v352_v63 = vpop.permute.xlu1 %351 }
  0xf1   :  { %v350_v0 = vpop.permute.xlu0 %349  ;;  %361 = vst.msk [vmem:[#allocation5 + $0x50] sm:$0xff] %vm357_vm13, %v352_v63 }
  0xf2   :  { %360 = vst.msk [vmem:[#allocation5 + $0x38] sm:$0xff] %vm357_vm13, %v350_v0 }
  0xf3   :  { %389 = vst.msk [vmem:[#allocation5 + $0x50] sm:$0xff] %vm382_vm14, %v377_v46  ;;  %387 = vst.msk [vmem:[#allocation5 + $0x38] sm:$0xff] %vm382_vm14, %v375_v43 }
  0xf4   :  { %v477_v1 = vpop.permute.xlu1 %476 }
  0xf5   :  { %v475_v2 = vpop.permute.xlu0 %474  ;;  %488 = vst.msk [vmem:[#allocation5 + $0x28] sm:$0xff] %vm486_vm15, %v477_v1 }
  0xf6   :  { %487 = vst.msk [vmem:[#allocation5 + $0x10] sm:$0xff] %vm486_vm15, %v475_v2 }
  0xf8   :  { %v481_v3 = vpop.permute.xlu1 %480 }
  0xf9   :  { %v479_v4 = vpop.permute.xlu0 %478  ;;  %490 = vst.msk [vmem:[#allocation5 + $0x58] sm:$0xff] %vm486_vm15, %v481_v3 }
  0xfa   :  { %489 = vst.msk [vmem:[#allocation5 + $0x40] sm:$0xff] %vm486_vm15, %v479_v4 }
  0xfc   :  { %v502_v5 = vpop.permute.xlu1 %501 }
  0xfd   :  { %v500_v6 = vpop.permute.xlu0 %499  ;;  %513 = vst.msk [vmem:[#allocation5 + $0x28] sm:$0xff] %vm511_vm1, %v502_v5 }
  0xfe   :  { %512 = vst.msk [vmem:[#allocation5 + $0x10] sm:$0xff] %vm511_vm1, %v500_v6 }
 0x100   :  { %v506_v7 = vpop.permute.xlu1 %505 }
 0x101   :  { %v504_v8 = vpop.permute.xlu0 %503  ;;  %515 = vst.msk [vmem:[#allocation5 + $0x58] sm:$0xff] %vm511_vm1, %v506_v7 }
 0x102   :  { %514 = vst.msk [vmem:[#allocation5 + $0x40] sm:$0xff] %vm511_vm1, %v504_v8 }
 0x103   :  { %520 = vsyncadd [#allocation4], 1152  ;;  %s620_s29 = smov [#allocation5]  }
 0x104   :  { %s521_s30 = sshll.u32 %s620_s29, 4  ;;  %s522_s30 = int_to_ptr.vmem [resolvable:$true] %s521_s30 }
 0x105   :  { %s576_s2 = scalar_lea.vmem %s522_s30, 384  ;;  %s580_s3 = scalar_lea.vmem %s522_s30, 1536 }
 0x106   :  { %p577_p5 = scmp.ne.s32.totalorder %s522_s30, %s576_s2  ;;  %p581_p6 = scmp.lt.s32.totalorder %s522_s30, %s522_s30 }
 0x107   :  { %p582_p7 = scmp.lt.s32.totalorder %s580_s3, %s576_s2 }
 0x109   :  { %p583_p8 = por %p582_p7, %p581_p6 }
 0x10b   :  { %p584_p9 = pnand %p583_p8, %p577_p5 }
 0x10d   :  { %587 = shalt.err (!%p584_p9)
}
 0x10e   :  { %s621_s4 = smov 384   ;;  %s622_s5 = smov 24  }
 0x10f   :  { %527 = dma.vmem_to_hbm [thread:$0]  %s522_s30, 384, %s796_s1, [#allocation4], %s621_s4, %s621_s4, %s622_s5  }
 0x110   :  { %598 = dma.done.wait [#allocation4], 1536  }
 0x111   :  { %599 = vsyncadd [#allocation4], 4294965760 }
 0x112   :  { %531 = vsyncpa [#allocation3], 1 }
 0x113   :  { %532 = vsyncpa [#allocation4], 1 }

</bundles_post_ra>
